<compile_context>
chip_gen: v5e
topology: v5e:2x2
jax: 0.10.0
libtpu: 0.0.40
codegen_flags: <defaults>
</compile_context>

<pallas_src>
import jax
import jax.numpy as jnp
from jax.experimental import pallas as pl
from jax.experimental.pallas import tpu as pltpu


def _round_up(x, m):
    return ((x + m - 1) // m) * m


def _vmem_capacity_bytes():
    """Best-effort VMEM capacity query (falls back to the v7x 64 MiB floor)."""
    try:
        info = pltpu.get_tpu_info()
        cap = int(getattr(info, "vmem_capacity_bytes", 0))
        if cap > 0:
            return cap
    except Exception:
        pass
    return 64 * 1024 * 1024


# ---------------------------------------------------------------------------
# Fused Pallas kernel: [conv1x1 + foldedBN + ReLU] * L  +  max over K
# ---------------------------------------------------------------------------
def _make_fused_kernel(num_layers, ts, K):
    """refs layout: (x_ref, w0, b0, w1, b1, ..., o_ref)
      x_ref : (ts*K, Cin)        bf16   grouped pixel rows
      w_l   : (Cin_l, Cout_l)    bf16   folded conv+BN weight
      b_l   : (1, Cout_l)        f32    folded conv+BN bias
      o_ref : (ts, Cout_pad)     f32    max over the K neighbours (lane-dense)
    """

    def kernel(*refs):
        x_ref = refs[0]
        o_ref = refs[-1]
        wb = refs[1:-1]

        y = x_ref[...]                                       # bf16 (ts*K, Cin)
        for l in range(num_layers):
            w = wb[2 * l][...]                               # bf16
            b = wb[2 * l + 1][...]                           # f32
            acc = jnp.dot(y, w, preferred_element_type=jnp.float32)  # MXU, f32 acc
            acc = jnp.maximum(acc + b, 0.0)                  # f32 epilogue (v5e-safe)
            if l + 1 < num_layers:
                y = acc.astype(jnp.bfloat16)                 # feed next MXU layer bf16
            else:
                y = acc                                      # keep last layer in f32

        cout = y.shape[-1]
        # K is a multiple of 8 (padded in the wrapper) -> tile-aligned reshape.
        o_ref[...] = jnp.max(y.reshape(ts, K, cout), axis=1)

    return kernel


def fused_mlp_max(grouped, layer_params):
    """Run the whole per-branch MLP + K-max in one pallas_call.

    grouped      : (BS, K, Cin) bfloat16, K % 8 == 0
    layer_params : list of (W_eff[Cin_l, Cout_l] f32, b_eff[Cout_l] f32)
    returns      : (BS, Cout_last) float32
    """
    BS, K, Cin = grouped.shape
    num_layers = len(layer_params)
    cout_last = layer_params[-1][0].shape[1]

    # Lane-dense output store: zero-pad the last layer to >= 128 out channels.
    cout_pad = max(128, _round_up(cout_last, 128))
    params = list(layer_params)
    if cout_pad != cout_last:
        w_l, b_l = params[-1]
        params[-1] = (jnp.pad(w_l, ((0, 0), (0, cout_pad - cout_last))),
                      jnp.pad(b_l, ((0, cout_pad - cout_last),)))

    # --- generation-aware tile sizing --------------------------------------
    vmem_cap = _vmem_capacity_bytes()
    target_rows = 8192 if vmem_cap >= 96 * 1024 * 1024 else 4096

    ts = max(8, ((target_rows // K) // 8) * 8)
    bs8 = _round_up(BS, 8)
    if bs8 >= 16:
        # Guarantee >= 2 grid steps so the "parallel" axis spans both v7x TCs.
        ts = min(ts, max(8, ((bs8 // 2) // 8) * 8))
    else:
        ts = min(ts, bs8)
    BS_pad = _round_up(BS, ts)
    rows = ts * K

    if grouped.dtype != jnp.bfloat16:            # normally already bf16
        grouped = grouped.astype(jnp.bfloat16)
    x = grouped
    if BS_pad != BS:
        x = jnp.pad(x, ((0, BS_pad - BS), (0, 0), (0, 0)))   # pad in bf16
    x2d = x.reshape(BS_pad * K, Cin)             # row-major, free reshape

    in_specs = [pl.BlockSpec((rows, Cin), lambda i: (i, 0))]
    args = [x2d]
    max_c = Cin
    param_bytes = 0
    for (w, b) in params:
        cin_l, cout_l = w.shape
        max_c = max(max_c, cout_l)
        in_specs.append(pl.BlockSpec((cin_l, cout_l), lambda i: (0, 0)))
        in_specs.append(pl.BlockSpec((1, cout_l), lambda i: (0, 0)))
        args.append(w.astype(jnp.bfloat16))
        args.append(b.reshape(1, cout_l).astype(jnp.float32))
        param_bytes += cin_l * cout_l * 2 + cout_l * 4

    # Per-step VMEM budget: double-buffered bf16 input + live f32/bf16
    # activations + double-buffered f32 output + (double-buffered) params.
    est = (2 * rows * Cin * 2
           + rows * max_c * 6
           + 2 * ts * cout_pad * 4
           + 2 * param_bytes)
    vmem_limit = int(min(max(2 * est, 32 * 1024 * 1024),
                         int(vmem_cap * 0.75)))

    out = pl.pallas_call(
        _make_fused_kernel(num_layers, ts, K),
        out_shape=jax.ShapeDtypeStruct((BS_pad, cout_pad), jnp.float32),
        grid_spec=pltpu.PrefetchScalarGridSpec(
            num_scalar_prefetch=0,
            grid=(BS_pad // ts,),
            in_specs=in_specs,
            out_specs=pl.BlockSpec((ts, cout_pad), lambda i: (i, 0)),
        ),
        compiler_params=pltpu.CompilerParams(
            dimension_semantics=("parallel",),    # independent tiles -> megacore
            vmem_limit_bytes=vmem_limit),
    )(*args)
    return out[:BS, :cout_last]


# ---------------------------------------------------------------------------
# Plain-JAX glue (sampling / grouping) — same semantics as the PyTorch helpers
# ---------------------------------------------------------------------------
def farthest_point_sample(xyz, npoint, key):
    """xyz: (B, N, 3) -> (B, npoint) int32 indices."""
    B, N, _ = xyz.shape
    farthest0 = jax.random.randint(key, (B,), 0, N, dtype=jnp.int32)
    distance0 = jnp.full((B, N), 1e10, dtype=jnp.float32)
    centroids0 = jnp.zeros((B, npoint), dtype=jnp.int32)
    batch_idx = jnp.arange(B)

    def body(i, carry):
        centroids, distance, farthest = carry
        centroids = centroids.at[:, i].set(farthest)
        centroid = xyz[batch_idx, farthest][:, None, :]          # (B,1,3)
        dist = jnp.sum((xyz - centroid) ** 2, -1)                # (B,N)
        distance = jnp.minimum(distance, dist)
        farthest = jnp.argmax(distance, -1).astype(jnp.int32)
        return centroids, distance, farthest

    centroids, _, _ = jax.lax.fori_loop(
        0, npoint, body, (centroids0, distance0, farthest0))
    return centroids


def index_points(points, idx):
    """points: (B, N, C), idx: (B, ...) -> (B, ..., C)."""
    return jax.vmap(lambda p, i: p[i])(points, idx)


def square_distance(src, dst):
    dist = -2.0 * jnp.matmul(src, dst.transpose(0, 2, 1))
    dist = dist + jnp.sum(src ** 2, -1)[:, :, None]
    dist = dist + jnp.sum(dst ** 2, -1)[:, None, :]
    return dist


def query_ball_point(radius, nsample, xyz, new_xyz):
    """top_k over masked indices (k smallest in-radius indices, ascending)
    — replaces the reference's full O(N log N) sort with identical results.

    NOTE: if no point is inside the radius the sentinel index N survives and
    JAX's gather clamps to N-1 (PyTorch would index OOB); kept as-is.
    """
    B, N, _ = xyz.shape
    sqrdists = square_distance(new_xyz, xyz)                      # (B,S,N)
    idx = jnp.arange(N, dtype=jnp.int32)
    keys = jnp.where(sqrdists > radius ** 2, jnp.int32(N), idx)   # (B,S,N)
    neg_top, _ = jax.lax.top_k(-keys, nsample)                    # ascending keys
    group_idx = -neg_top
    group_first = group_idx[:, :, 0:1]
    group_idx = jnp.where(group_idx == N,
                          jnp.broadcast_to(group_first, group_idx.shape),
                          group_idx)
    return group_idx


# ---------------------------------------------------------------------------
# Module
# ---------------------------------------------------------------------------
class PointNetSetAbstractionMsg:
    def __init__(self, npoint, radius_list, nsample_list, in_channel, mlp_list, key):
        self.npoint = npoint
        self.radius_list = radius_list
        self.nsample_list = nsample_list
        self.params = []  # per branch: list of (W_eff[Cin,Cout], b_eff[Cout])
        eps = 1e-5
        for i in range(len(mlp_list)):
            layer_params = []
            last_channel = in_channel + 3
            for out_channel in mlp_list[i]:
                key, k1, k2, k3, k4, k5, k6 = jax.random.split(key, 7)
                # Conv2d(last_channel, out_channel, 1) weights (deterministic init)
                fan_in = float(last_channel)
                w = jax.random.uniform(
                    k1, (last_channel, out_channel), jnp.float32,
                    -1.0 / jnp.sqrt(fan_in), 1.0 / jnp.sqrt(fan_in))
                conv_b = jax.random.uniform(
                    k2, (out_channel,), jnp.float32,
                    -1.0 / jnp.sqrt(fan_in), 1.0 / jnp.sqrt(fan_in))
                # BatchNorm2d params + running stats (eval-mode fold)
                gamma = 1.0 + 0.1 * jax.random.normal(k3, (out_channel,), jnp.float32)
                beta = 0.1 * jax.random.normal(k4, (out_channel,), jnp.float32)
                run_mean = 0.1 * jax.random.normal(k5, (out_channel,), jnp.float32)
                run_var = 1.0 + 0.1 * jnp.abs(
                    jax.random.normal(k6, (out_channel,), jnp.float32))
                scale = gamma / jnp.sqrt(run_var + eps)
                w_eff = w * scale[None, :]
                b_eff = (conv_b - run_mean) * scale + beta
                layer_params.append((w_eff, b_eff))
                last_channel = out_channel
            self.params.append(layer_params)

    def __call__(self, xyz, points, key):
        """
        xyz:    (B, 3, N)
        points: (B, D, N) or None
        returns new_xyz (B, 3, S), new_points_concat (B, sum(last mlp ch), S)
        """
        xyz_t = jnp.transpose(xyz, (0, 2, 1))                     # (B, N, 3) f32
        # Point features go to bf16 BEFORE the gather: halves grouped HBM bytes.
        points_bf = (jnp.transpose(points, (0, 2, 1)).astype(jnp.bfloat16)
                     if points is not None else None)
        B, N, _ = xyz_t.shape
        S = self.npoint

        fps_idx = farthest_point_sample(xyz_t, S, key)
        new_xyz = index_points(xyz_t, fps_idx)                    # (B, S, 3)

        new_points_list = []
        for i, radius in enumerate(self.radius_list):
            K = self.nsample_list[i]
            group_idx = query_ball_point(radius, K, xyz_t, new_xyz)     # (B,S,K)

            # Pad K to a multiple of 8 by repeating the first neighbour:
            # duplicates are neutral under the final max and keep the in-kernel
            # reshape tile-aligned for any nsample.
            K_pad = _round_up(K, 8)
            if K_pad != K:
                pad = jnp.broadcast_to(group_idx[:, :, 0:1], (B, S, K_pad - K))
                group_idx = jnp.concatenate([group_idx, pad], axis=-1)

            # xyz residual in f32 (only 3 channels), then bf16 for the kernel.
            grouped_xyz = index_points(xyz_t, group_idx) - new_xyz[:, :, None, :]
            grouped_xyz = grouped_xyz.astype(jnp.bfloat16)              # (B,S,Kp,3)
            if points_bf is not None:
                grouped_pts = index_points(points_bf, group_idx)        # (B,S,Kp,D)
                grouped = jnp.concatenate([grouped_pts, grouped_xyz], -1)
            else:
                grouped = grouped_xyz

            # Fused Pallas kernel: full MLP chain + max over neighbours.
            feats = fused_mlp_max(
                grouped.reshape(B * S, K_pad, grouped.shape[-1]),
                self.params[i])                                         # (B*S, Cout)
            new_points_list.append(
                feats.reshape(B, S, -1).transpose(0, 2, 1))             # (B, Cout, S)

        new_xyz_out = jnp.transpose(new_xyz, (0, 2, 1))                 # (B, 3, S)
        new_points_concat = jnp.concatenate(new_points_list, axis=1)
        return new_xyz_out, new_points_concat


# ---------------------------------------------------------------------------
if __name__ == "__main__":
    key = jax.random.PRNGKey(0)
    k_xyz, k_pts, k_params, k_fps = jax.random.split(key, 4)

    B, N, D = 2, 32, 4          # batch, points, extra feature channels
    npoint = 8
    radius_list = [0.4, 0.8]
    nsample_list = [8, 16]
    mlp_list = [[8, 16], [16, 32]]

    xyz = jax.random.normal(k_xyz, (B, 3, N), dtype=jnp.float32)
    points = jax.random.normal(k_pts, (B, D, N), dtype=jnp.float32)

    module = PointNetSetAbstractionMsg(
        npoint, radius_list, nsample_list, in_channel=D,
        mlp_list=mlp_list, key=k_params)

    forward = jax.jit(lambda a, b, c: module(a, b, c))
    new_xyz, new_feats = forward(xyz, points, k_fps)
    jax.block_until_ready(new_xyz)
    jax.block_until_ready(new_feats)

    assert new_xyz.shape == (B, 3, npoint)
    assert new_feats.shape == (B, sum(m[-1] for m in mlp_list), npoint)
    print("KERNEL_OK")
</pallas_src>

<mosaic_0001>
module attributes {stable_mosaic.version = 11 : i64} {
  func.func @kernel(%arg0: i32, %arg1: memref<64x7xbf16, #tpu.memory_space<vmem>>, %arg2: memref<7x8xbf16, #tpu.memory_space<vmem>>, %arg3: memref<1x8xf32, #tpu.memory_space<vmem>>, %arg4: memref<8x128xbf16, #tpu.memory_space<vmem>>, %arg5: memref<1x128xf32, #tpu.memory_space<vmem>>, %arg6: memref<8x128xf32, #tpu.memory_space<vmem>>) attributes {dimension_semantics = [#tpu.dimension_semantics<parallel>], iteration_bounds = array<i64: 2>, scalar_prefetch = 0 : i64, scratch_operands = 0 : i64, tpu.core_type = #tpu.core_type<tc>, window_params = [{transform_indices = @transform_0, window_bounds = array<i64: 64, 7>}, {pipeline_mode = #tpu.pipeline_mode<synchronous>, transform_indices = @transform_1, window_bounds = array<i64: 7, 8>}, {pipeline_mode = #tpu.pipeline_mode<synchronous>, transform_indices = @transform_2, window_bounds = array<i64: 1, 8>}, {pipeline_mode = #tpu.pipeline_mode<synchronous>, transform_indices = @transform_3, window_bounds = array<i64: 8, 128>}, {pipeline_mode = #tpu.pipeline_mode<synchronous>, transform_indices = @transform_4, window_bounds = array<i64: 1, 128>}, {transform_indices = @transform_5, window_bounds = array<i64: 8, 128>}]} {
    %c0 = arith.constant 0 : index
    %c0_0 = arith.constant 0 : index
    %0 = vector.load %arg1[%c0, %c0_0] : memref<64x7xbf16, #tpu.memory_space<vmem>>, vector<64x7xbf16>
    %c0_1 = arith.constant 0 : index
    %c0_2 = arith.constant 0 : index
    %1 = vector.load %arg2[%c0_1, %c0_2] : memref<7x8xbf16, #tpu.memory_space<vmem>>, vector<7x8xbf16>
    %c0_3 = arith.constant 0 : index
    %c0_4 = arith.constant 0 : index
    %2 = vector.load %arg3[%c0_3, %c0_4] : memref<1x8xf32, #tpu.memory_space<vmem>>, vector<1x8xf32>
    %cst = arith.constant dense<0.000000e+00> : vector<64x8xf32>
    %3 = tpu.matmul %0, %1, %cst {dimension_numbers = #tpu.dot_dimension_numbers<[1], [0], [0], [1], [0, 0, 1, 1], [], []>} : vector<64x7xbf16>, vector<7x8xbf16>, vector<64x8xf32> -> vector<64x8xf32>
    %4 = vector.broadcast %2 : vector<1x8xf32> to vector<64x8xf32>
    %5 = arith.addf %3, %4 : vector<64x8xf32>
    %cst_5 = arith.constant 0.000000e+00 : f32
    %6 = vector.broadcast %cst_5 : f32 to vector<64x8xf32>
    %7 = arith.maximumf %5, %6 : vector<64x8xf32>
    %8 = arith.truncf %7 : vector<64x8xf32> to vector<64x8xbf16>
    %c0_6 = arith.constant 0 : index
    %c0_7 = arith.constant 0 : index
    %9 = vector.load %arg4[%c0_6, %c0_7] : memref<8x128xbf16, #tpu.memory_space<vmem>>, vector<8x128xbf16>
    %c0_8 = arith.constant 0 : index
    %c0_9 = arith.constant 0 : index
    %10 = vector.load %arg5[%c0_8, %c0_9] : memref<1x128xf32, #tpu.memory_space<vmem>>, vector<1x128xf32>
    %cst_10 = arith.constant dense<0.000000e+00> : vector<64x128xf32>
    %11 = tpu.matmul %8, %9, %cst_10 {dimension_numbers = #tpu.dot_dimension_numbers<[1], [0], [0], [1], [0, 0, 1, 1], [], []>} : vector<64x8xbf16>, vector<8x128xbf16>, vector<64x128xf32> -> vector<64x128xf32>
    %12 = vector.broadcast %10 : vector<1x128xf32> to vector<64x128xf32>
    %13 = arith.addf %11, %12 : vector<64x128xf32>
    %cst_11 = arith.constant 0.000000e+00 : f32
    %14 = vector.broadcast %cst_11 : f32 to vector<64x128xf32>
    %15 = arith.maximumf %13, %14 : vector<64x128xf32>
    %16 = vector.shape_cast %15 : vector<64x128xf32> to vector<8x8x128xf32>
    %cst_12 = arith.constant dense<0xFF800000> : vector<8x128xf32>
    %17 = vector.multi_reduction <maximumf>, %16, %cst_12 [1] : vector<8x8x128xf32> to vector<8x128xf32>
    %c0_13 = arith.constant 0 : index
    %c0_14 = arith.constant 0 : index
    %18 = vector.load %arg6[%c0_13, %c0_14] : memref<8x128xf32, #tpu.memory_space<vmem>>, vector<8x128xf32>
    tpu.vector_store %arg6[%c0_13, %c0_14], %17 {strides = array<i32>} : memref<8x128xf32, #tpu.memory_space<vmem>>, vector<8x128xf32>,
    return
  }
  func.func @transform_0(%arg0: i32) -> (i32, i32) {
    %c0_i32 = arith.constant 0 : i32
    %c0_i32_0 = arith.constant 0 : i32
    return %arg0, %c0_i32 : i32, i32
  }
  func.func @transform_1(%arg0: i32) -> (i32, i32) {
    %c0_i32 = arith.constant 0 : i32
    %c0_i32_0 = arith.constant 0 : i32
    %c0_i32_1 = arith.constant 0 : i32
    return %c0_i32, %c0_i32_0 : i32, i32
  }
  func.func @transform_2(%arg0: i32) -> (i32, i32) {
    %c0_i32 = arith.constant 0 : i32
    %c0_i32_0 = arith.constant 0 : i32
    %c0_i32_1 = arith.constant 0 : i32
    return %c0_i32, %c0_i32_0 : i32, i32
  }
  func.func @transform_3(%arg0: i32) -> (i32, i32) {
    %c0_i32 = arith.constant 0 : i32
    %c0_i32_0 = arith.constant 0 : i32
    %c0_i32_1 = arith.constant 0 : i32
    return %c0_i32, %c0_i32_0 : i32, i32
  }
  func.func @transform_4(%arg0: i32) -> (i32, i32) {
    %c0_i32 = arith.constant 0 : i32
    %c0_i32_0 = arith.constant 0 : i32
    %c0_i32_1 = arith.constant 0 : i32
    return %c0_i32, %c0_i32_0 : i32, i32
  }
  func.func @transform_5(%arg0: i32) -> (i32, i32) {
    %c0_i32 = arith.constant 0 : i32
    %c0_i32_0 = arith.constant 0 : i32
    return %arg0, %c0_i32 : i32, i32
  }
}

module attributes {stable_mosaic.version = 11 : i64} {
  func.func @kernel(%arg0: i32, %arg1: memref<128x7xbf16, #tpu.memory_space<vmem>>, %arg2: memref<7x16xbf16, #tpu.memory_space<vmem>>, %arg3: memref<1x16xf32, #tpu.memory_space<vmem>>, %arg4: memref<16x128xbf16, #tpu.memory_space<vmem>>, %arg5: memref<1x128xf32, #tpu.memory_space<vmem>>, %arg6: memref<8x128xf32, #tpu.memory_space<vmem>>) attributes {dimension_semantics = [#tpu.dimension_semantics<parallel>], iteration_bounds = array<i64: 2>, scalar_prefetch = 0 : i64, scratch_operands = 0 : i64, tpu.core_type = #tpu.core_type<tc>, window_params = [{transform_indices = @transform_0, window_bounds = array<i64: 128, 7>}, {pipeline_mode = #tpu.pipeline_mode<synchronous>, transform_indices = @transform_1, window_bounds = array<i64: 7, 16>}, {pipeline_mode = #tpu.pipeline_mode<synchronous>, transform_indices = @transform_2, window_bounds = array<i64: 1, 16>}, {pipeline_mode = #tpu.pipeline_mode<synchronous>, transform_indices = @transform_3, window_bounds = array<i64: 16, 128>}, {pipeline_mode = #tpu.pipeline_mode<synchronous>, transform_indices = @transform_4, window_bounds = array<i64: 1, 128>}, {transform_indices = @transform_5, window_bounds = array<i64: 8, 128>}]} {
    %c0 = arith.constant 0 : index
    %c0_0 = arith.constant 0 : index
    %0 = vector.load %arg1[%c0, %c0_0] : memref<128x7xbf16, #tpu.memory_space<vmem>>, vector<128x7xbf16>
    %c0_1 = arith.constant 0 : index
    %c0_2 = arith.constant 0 : index
    %1 = vector.load %arg2[%c0_1, %c0_2] : memref<7x16xbf16, #tpu.memory_space<vmem>>, vector<7x16xbf16>
    %c0_3 = arith.constant 0 : index
    %c0_4 = arith.constant 0 : index
    %2 = vector.load %arg3[%c0_3, %c0_4] : memref<1x16xf32, #tpu.memory_space<vmem>>, vector<1x16xf32>
    %cst = arith.constant dense<0.000000e+00> : vector<128x16xf32>
    %3 = tpu.matmul %0, %1, %cst {dimension_numbers = #tpu.dot_dimension_numbers<[1], [0], [0], [1], [0, 0, 1, 1], [], []>} : vector<128x7xbf16>, vector<7x16xbf16>, vector<128x16xf32> -> vector<128x16xf32>
    %4 = vector.broadcast %2 : vector<1x16xf32> to vector<128x16xf32>
    %5 = arith.addf %3, %4 : vector<128x16xf32>
    %cst_5 = arith.constant 0.000000e+00 : f32
    %6 = vector.broadcast %cst_5 : f32 to vector<128x16xf32>
    %7 = arith.maximumf %5, %6 : vector<128x16xf32>
    %8 = arith.truncf %7 : vector<128x16xf32> to vector<128x16xbf16>
    %c0_6 = arith.constant 0 : index
    %c0_7 = arith.constant 0 : index
    %9 = vector.load %arg4[%c0_6, %c0_7] : memref<16x128xbf16, #tpu.memory_space<vmem>>, vector<16x128xbf16>
    %c0_8 = arith.constant 0 : index
    %c0_9 = arith.constant 0 : index
    %10 = vector.load %arg5[%c0_8, %c0_9] : memref<1x128xf32, #tpu.memory_space<vmem>>, vector<1x128xf32>
    %cst_10 = arith.constant dense<0.000000e+00> : vector<128x128xf32>
    %11 = tpu.matmul %8, %9, %cst_10 {dimension_numbers = #tpu.dot_dimension_numbers<[1], [0], [0], [1], [0, 0, 1, 1], [], []>} : vector<128x16xbf16>, vector<16x128xbf16>, vector<128x128xf32> -> vector<128x128xf32>
    %12 = vector.broadcast %10 : vector<1x128xf32> to vector<128x128xf32>
    %13 = arith.addf %11, %12 : vector<128x128xf32>
    %cst_11 = arith.constant 0.000000e+00 : f32
    %14 = vector.broadcast %cst_11 : f32 to vector<128x128xf32>
    %15 = arith.maximumf %13, %14 : vector<128x128xf32>
    %16 = vector.shape_cast %15 : vector<128x128xf32> to vector<8x16x128xf32>
    %cst_12 = arith.constant dense<0xFF800000> : vector<8x128xf32>
    %17 = vector.multi_reduction <maximumf>, %16, %cst_12 [1] : vector<8x16x128xf32> to vector<8x128xf32>
    %c0_13 = arith.constant 0 : index
    %c0_14 = arith.constant 0 : index
    %18 = vector.load %arg6[%c0_13, %c0_14] : memref<8x128xf32, #tpu.memory_space<vmem>>, vector<8x128xf32>
    tpu.vector_store %arg6[%c0_13, %c0_14], %17 {strides = array<i32>} : memref<8x128xf32, #tpu.memory_space<vmem>>, vector<8x128xf32>,
    return
  }
  func.func @transform_0(%arg0: i32) -> (i32, i32) {
    %c0_i32 = arith.constant 0 : i32
    %c0_i32_0 = arith.constant 0 : i32
    return %arg0, %c0_i32 : i32, i32
  }
  func.func @transform_1(%arg0: i32) -> (i32, i32) {
    %c0_i32 = arith.constant 0 : i32
    %c0_i32_0 = arith.constant 0 : i32
    %c0_i32_1 = arith.constant 0 : i32
    return %c0_i32, %c0_i32_0 : i32, i32
  }
  func.func @transform_2(%arg0: i32) -> (i32, i32) {
    %c0_i32 = arith.constant 0 : i32
    %c0_i32_0 = arith.constant 0 : i32
    %c0_i32_1 = arith.constant 0 : i32
    return %c0_i32, %c0_i32_0 : i32, i32
  }
  func.func @transform_3(%arg0: i32) -> (i32, i32) {
    %c0_i32 = arith.constant 0 : i32
    %c0_i32_0 = arith.constant 0 : i32
    %c0_i32_1 = arith.constant 0 : i32
    return %c0_i32, %c0_i32_0 : i32, i32
  }
  func.func @transform_4(%arg0: i32) -> (i32, i32) {
    %c0_i32 = arith.constant 0 : i32
    %c0_i32_0 = arith.constant 0 : i32
    %c0_i32_1 = arith.constant 0 : i32
    return %c0_i32, %c0_i32_0 : i32, i32
  }
  func.func @transform_5(%arg0: i32) -> (i32, i32) {
    %c0_i32 = arith.constant 0 : i32
    %c0_i32_0 = arith.constant 0 : i32
    return %arg0, %c0_i32 : i32, i32
  }
}

</mosaic_0001>

<bundles_post_ra>
// kernel: custom-call.12
= control target key start
LH: loop header
LB: loop body
LE: loop exit
PB: predicated region body
PF: predicated region fallthrough
CT: control target
= control target key end

     0   :  { %s6_s0 = inlined_call_operand.vmem [shape: f32[2,32], index: 0, kind: output, shape index: {}]  }

// kernel: _lambda_.2
= control target key start
LH: loop header
LB: loop body
LE: loop exit
PB: predicated region body
PF: predicated region fallthrough
CT: control target
= control target key end

     0   :  { %s593_s18 = smov 0   ;;  %s633_s0 = inlined_call_operand.vmem [shape: bf16[128,7], index: 0, kind: input, shape index: {}]   ;;  %s634_s1 = inlined_call_operand.vmem [shape: bf16[7,8], index: 1, kind: input, shape index: {}]   ;;  %s635_s2 = inlined_call_operand.vmem [shape: f32[1,8], index: 2, kind: input, shape index: {}]   ;;  %s636_s3 = inlined_call_operand.vmem [shape: bf16[8,128], index: 3, kind: input, shape index: {}]   ;;  %s637_s4 = inlined_call_operand.vmem [shape: f32[1,128], index: 4, kind: input, shape index: {}]   ;;  %s638_s5 = inlined_call_operand.vmem [shape: f32[16,128], index: 5, kind: output, shape index: {}]  }
   0x1 LB: > { %s599_s19 = sadd.s32 4294967295, %s560_s18   ;;  %p507_p0 = scmp.ge.s32.totalorder %s560_s18, 1  ;;  %s560_s18 = sphi %s593_s18, %s15_s18  }
   0x2   : > { %p188_p1 = scmp.lt.s32.totalorder %s560_s18, 3 }
   0x4   : > { %p189_p2 = pnand %p507_p0, %p188_p1 }
   0x5   : > { %s508_s22 = sshll.u32 (!%p189_p2), %s599_s19, 3  ;;  %p221_p4 = scmp.lt.s32.totalorder (!%p189_p2), %s599_s19, 1 }
   0x6   : > { %192 = sbr.rel (%p189_p2) target bundleno = 339 (0x153), region = 40  ;;  %p216_p3 = scmp.lt.s32.totalorder (!%p189_p2), %s508_s22, 15 }
   0xb   : > { %v234_v0 = vld [vmem:[%s634_s1] sm:$0xf]  ;;  %vm272_vm0 = vcmask 1042432   ;;  %vm273_vm1 = vcmask 1043456   ;;  %v562_v1 = vmov 65535   ;;  %s640_s22 = smov (!%p216_p3, %s508_s22), 15 }
   0xc   : > { %v274_v2 = vsel %vm272_vm0, 4294967295, %v562_v1  ;;  %s509_s23 = sshll.u32 %s640_s22, 2  ;;  %vm259_vm2 = vcmask 56320   ;;  %v320_v9 = vld [vmem:[%s636_s3] sm:$0xf]  ;;  %vm325_vm3 = vcmask 64512  }
   0xd   : > { %v275_v3 = vsel %vm273_vm1, %v274_v2, 0  ;;  %s219_s26 = scalar_lea.vmem %s633_s0, %s509_s23  ;;  %v339_v10 = vsel %vm273_vm1, %v320_v9, 0  ;;  %v552_v12 = vld [vmem:[%s635_s2] ss:$0 sm:$0xff]  ;;  %vm434_vm4 = vcmask 1041409   ;;  %vm436_vm5 = vcmask 1042434  }
   0xe   : > { %v277_v4 = vand.u32 %v275_v3, %v234_v0  ;;  %v537_v5 = vld [vmem:[%s219_s26] sm:$0xff]  ;;  %v539_v6 = vld [vmem:[%s219_s26 + $0x10] sm:$0xff]  ;;  %v538_v7 = vld [vmem:[%s219_s26 + $0x8] sm:$0xff]  ;;  %348 = vmatpush.bf16.msra.mxu1 %v339_v10  ;;  %542 = vmatpush.bf16.msra.mxu3 %v339_v10  ;;  %vm438_vm6 = vcmask 1043459   ;;  %vm440_vm7 = vcmask 1044484   ;;  %s642_s19 = smov (!%p221_p4, %s599_s19), 1 }
   0xf   : > { %v540_v8 = vld [vmem:[%s219_s26 + $0x18] sm:$0xff]  ;;  %v553_v41 = vld [vmem:[%s637_s4] ss:$0 sm:$0xff]  ;;  %vm442_vm8 = vcmask 1045509   ;;  %s510_s8 = sshll.u32 %s642_s19, 3  ;;  %vm444_vm9 = vcmask 1046534  }
  0x10   : > { %286 = vmatpush.bf16.msra.mxu0 %v277_v4  ;;  %541 = vmatpush.bf16.msra.mxu2 %v277_v4  ;;  %vm446_vm10 = vcmask 1047559   ;;  %s224_s11 = scalar_lea.vmem %s638_s5, %s510_s8 }
  0x13   : > { %527 = vmatmul.msk.bf16.vlgmr.msra.gmra.mxu0 %vm259_vm2, %v537_v5  ;;  %529 = vmatmul.msk.bf16.vlgmr.msra.gmra.mxu2 %vm259_vm2, %v539_v6 }
  0x23   : > { %528 = vmatmul.msk.bf16.gmra.mxu0 %vm259_vm2, %v538_v7  ;;  %530 = vmatmul.msk.bf16.gmra.mxu2 %vm259_vm2, %v540_v8 }
  0x90   : > { %v288_v11 = vpop.f32.mrf.mxu0 }
  0x91   : > { %v289_v13 = vadd.f32 %v552_v12, %v288_v11 }
  0x93   : > { %v308_v16 = vmax.f32 %v289_v13, 0.0 }
  0x96   : > { %v298_v14 = vpop.f32.mrf.mxu2 }
  0x97   : > { %v299_v19 = vadd.f32 %v552_v12, %v298_v14 }
  0x98   : > { %v290_v15 = vpop.f32.mrf.mxu0 }
  0x99   : > { %v291_v17 = vadd.f32 %v552_v12, %v290_v15  ;;  %v312_v24 = vmax.f32 %v299_v19, 0.0 }
  0x9b   : > { %v309_v18 = vmax.f32 %v291_v17, 0.0 }
  0x9d   : > { %v316_v20 = vpack.c.bf16 %v309_v18, %v308_v16 }
  0x9e   : > { %v300_v21 = vpop.f32.mrf.mxu2 }
  0x9f   : > { %v301_v22 = vadd.f32 %v552_v12, %v300_v21  ;;  %531 = vmatmul.msk.bf16.vlgmr.msra.gmra.mxu1 %vm325_vm3, %v316_v20 }
  0xa0   : > { %v293_v23 = vpop.f32.mrf.mxu0 }
  0xa1   : > { %v313_v25 = vmax.f32 %v301_v22, 0.0  ;;  %v294_v27 = vadd.f32 %v552_v12, %v293_v23 }
  0xa3   : > { %v318_v26 = vpack.c.bf16 %v313_v25, %v312_v24  ;;  %v310_v30 = vmax.f32 %v294_v27, 0.0 }
  0xa5   : > { %533 = vmatmul.msk.bf16.vlgmr.msra.gmra.mxu3 %vm325_vm3, %v318_v26 }
  0xa6   : > { %v303_v28 = vpop.f32.mrf.mxu2 }
  0xa7   : > { %v304_v33 = vadd.f32 %v552_v12, %v303_v28 }
  0xa8   : > { %v295_v29 = vpop.f32.mrf.mxu0 }
  0xa9   : > { %v296_v31 = vadd.f32 %v552_v12, %v295_v29  ;;  %v314_v37 = vmax.f32 %v304_v33, 0.0 }
  0xab   : > { %v311_v32 = vmax.f32 %v296_v31, 0.0 }
  0xad   : > { %v317_v34 = vpack.c.bf16 %v311_v32, %v310_v30 }
  0xae   : > { %v305_v35 = vpop.f32.mrf.mxu2 }
  0xaf   : > { %v306_v36 = vadd.f32 %v552_v12, %v305_v35  ;;  %532 = vmatmul.msk.bf16.gmra.mxu1 %vm325_vm3, %v317_v34 }
  0xb1   : > { %v315_v38 = vmax.f32 %v306_v36, 0.0 }
  0xb3   : > { %v319_v39 = vpack.c.bf16 %v315_v38, %v314_v37 }
  0xb5   : > { %534 = vmatmul.msk.bf16.gmra.mxu3 %vm325_vm3, %v319_v39 }
 0x11c   : > { %v350_v40 = vpop.f32.mrf.mxu1 }
 0x11d   : > { %v351_v44 = vadd.f32 %v553_v41, %v350_v40 }
 0x11f   : > { %v370_v47 = vmax.f32 %v351_v44, 0.0 }
 0x121   : > { %v378_v52 = vrot.slane %v370_v47, 4 }
 0x123   : > { %v379_v59 = vmax.f32 %v370_v47, %v378_v52 }
 0x124   : > { %v352_v42 = vpop.f32.mrf.mxu1 }
 0x125   : > { %v353_v43 = vadd.f32 %v553_v41, %v352_v42  ;;  %v380_v3 = vrot.slane %v379_v59, 2 }
 0x127   : > { %v371_v46 = vmax.f32 %v353_v43, 0.0  ;;  %v381_v12 = vmax.f32 %v379_v59, %v380_v3 }
 0x128   : > { %v360_v45 = vpop.f32.mrf.mxu3 }
 0x129   : > { %v361_v48 = vadd.f32 %v553_v41, %v360_v45  ;;  %v384_v50 = vrot.slane %v371_v46, 4  ;;  %v382_v21 = vrot.slane %v381_v12, 1 }
 0x12b   : > { %v374_v54 = vmax.f32 %v361_v48, 0.0  ;;  %v385_v56 = vmax.f32 %v371_v46, %v384_v50  ;;  %v383_v32 = vmax.f32 %v381_v12, %v382_v21 }
 0x12c   : > { %v355_v49 = vpop.f32.mrf.mxu1 }
 0x12d   : > { %v356_v51 = vadd.f32 %v553_v41, %v355_v49  ;;  %v402_v62 = vrot.slane %v374_v54, 4  ;;  %v386_v0 = vrot.slane %v385_v56, 2 }
 0x12f   : > { %v372_v53 = vmax.f32 %v356_v51, 0.0  ;;  %v403_v5 = vmax.f32 %v374_v54, %v402_v62  ;;  %v387_v8 = vmax.f32 %v385_v56, %v386_v0 }
 0x130   : > { %v362_v55 = vpop.f32.mrf.mxu3 }
 0x131   : > { %v390_v57 = vrot.slane %v372_v53, 4  ;;  %v363_v58 = vadd.f32 %v553_v41, %v362_v55  ;;  %v404_v15 = vrot.slane %v403_v5, 2  ;;  %v388_v17 = vrot.slane %v387_v8, 1 }
 0x133   : > { %v391_v60 = vmax.f32 %v372_v53, %v390_v57  ;;  %v375_v61 = vmax.f32 %v363_v58, 0.0  ;;  %v405_v24 = vmax.f32 %v403_v5, %v404_v15  ;;  %v389_v27 = vmax.f32 %v387_v8, %v388_v17 }
 0x134   : > { %v357_v63 = vpop.f32.mrf.mxu1 }
 0x135   : > { %v392_v1 = vrot.slane %v391_v60, 2  ;;  %v358_v2 = vadd.f32 %v553_v41, %v357_v63  ;;  %v408_v4 = vrot.slane %v375_v61, 4  ;;  %v406_v35 = vrot.slane %v405_v24, 1 }
 0x136   : > { %v435_v38 = vsel %vm434_vm4, %v389_v27, %v383_v32 }
 0x137   : > { %v373_v6 = vmax.f32 %v358_v2, 0.0  ;;  %v393_v10 = vmax.f32 %v391_v60, %v392_v1  ;;  %v409_v13 = vmax.f32 %v375_v61, %v408_v4  ;;  %v407_v44 = vmax.f32 %v405_v24, %v406_v35 }
 0x138   : > { %v365_v7 = vpop.f32.mrf.mxu3 }
 0x139   : > { %v366_v9 = vadd.f32 %v553_v41, %v365_v7  ;;  %v396_v11 = vrot.slane %v373_v6, 4  ;;  %v394_v19 = vrot.slane %v393_v10, 1  ;;  %v410_v22 = vrot.slane %v409_v13, 2 }
 0x13b   : > { %v376_v14 = vmax.f32 %v366_v9, 0.0  ;;  %v397_v16 = vmax.f32 %v373_v6, %v396_v11  ;;  %v395_v30 = vmax.f32 %v393_v10, %v394_v19  ;;  %v411_v33 = vmax.f32 %v409_v13, %v410_v22 }
 0x13d   : > { %v414_v18 = vrot.slane %v376_v14, 4  ;;  %v398_v20 = vrot.slane %v397_v16, 2  ;;  %v437_v40 = vsel %vm436_vm5, %v395_v30, %v435_v38  ;;  %v412_v42 = vrot.slane %v411_v33, 1 }
 0x13f   : > { %v415_v23 = vmax.f32 %v376_v14, %v414_v18  ;;  %v399_v25 = vmax.f32 %v397_v16, %v398_v20  ;;  %v413_v48 = vmax.f32 %v411_v33, %v412_v42 }
 0x140   : > { %v367_v26 = vpop.f32.mrf.mxu3 }
 0x141   : > { %v416_v28 = vrot.slane %v415_v23, 2  ;;  %v368_v29 = vadd.f32 %v553_v41, %v367_v26  ;;  %v400_v31 = vrot.slane %v399_v25, 1 }
 0x143   : > { %v377_v34 = vmax.f32 %v368_v29, 0.0  ;;  %v401_v36 = vmax.f32 %v399_v25, %v400_v31  ;;  %v417_v37 = vmax.f32 %v415_v23, %v416_v28 }
 0x145   : > { %v420_v39 = vrot.slane %v377_v34, 4  ;;  %v439_v43 = vsel %vm438_vm6, %v401_v36, %v437_v40  ;;  %v418_v45 = vrot.slane %v417_v37, 1 }
 0x146   : > { %v441_v47 = vsel %vm440_vm7, %v407_v44, %v439_v43 }
 0x147   : > { %v421_v41 = vmax.f32 %v377_v34, %v420_v39  ;;  %v419_v50 = vmax.f32 %v417_v37, %v418_v45  ;;  %v443_v51 = vsel %vm442_vm8, %v413_v48, %v441_v47 }
 0x149   : > { %v422_v46 = vrot.slane %v421_v41, 2  ;;  %v445_v54 = vsel %vm444_vm9, %v419_v50, %v443_v51 }
 0x14b   : > { %v423_v49 = vmax.f32 %v421_v41, %v422_v46 }
 0x14d   : > { %v424_v52 = vrot.slane %v423_v49, 1 }
 0x14f   : > { %v425_v53 = vmax.f32 %v423_v49, %v424_v52 }
 0x151   : > { %v447_v55 = vsel %vm446_vm10, %v425_v53, %v445_v54 }
 0x152   : > { %449 = vst [vmem:[%s224_s11] sm:$0xff] %v447_v55 }
 0x153 PF: > { %s15_s18 = sadd.s32 1, %s560_s18  }
 0x154   : > { %p12_p5 = scmp.ge.s32.totalorder %s15_s18, 4  }
 0x156   :  { %14 = sbr.rel (!%p12_p5) target bundleno = 1 (0x1), region = 70 }

// kernel: _lambda_.3
= control target key start
LH: loop header
LB: loop body
LE: loop exit
PB: predicated region body
PF: predicated region fallthrough
CT: control target
= control target key end

     0   :  { %s750_s18 = smov 0   ;;  %s818_s0 = inlined_call_operand.vmem [shape: bf16[256,7], index: 0, kind: input, shape index: {}]   ;;  %s819_s1 = inlined_call_operand.vmem [shape: bf16[7,16], index: 1, kind: input, shape index: {}]   ;;  %s820_s2 = inlined_call_operand.vmem [shape: f32[1,16], index: 2, kind: input, shape index: {}]   ;;  %s821_s3 = inlined_call_operand.vmem [shape: bf16[16,128], index: 3, kind: input, shape index: {}]   ;;  %s822_s4 = inlined_call_operand.vmem [shape: f32[1,128], index: 4, kind: input, shape index: {}]   ;;  %s823_s5 = inlined_call_operand.vmem [shape: f32[16,128], index: 5, kind: output, shape index: {}]  }
   0x1 LB: > { %s756_s19 = sadd.s32 4294967295, %s717_s18   ;;  %p631_p0 = scmp.ge.s32.totalorder %s717_s18, 1  ;;  %s717_s18 = sphi %s750_s18, %s15_s18  }
   0x2   : > { %p188_p1 = scmp.lt.s32.totalorder %s717_s18, 3 }
   0x4   : > { %p189_p2 = pnand %p631_p0, %p188_p1 }
   0x5   : > { %s632_s22 = sshll.u32 (!%p189_p2), %s756_s19, 4  ;;  %p221_p4 = scmp.lt.s32.totalorder (!%p189_p2), %s756_s19, 1 }
   0x6   : > { %192 = sbr.rel (%p189_p2) target bundleno = 373 (0x175), region = 40  ;;  %p216_p3 = scmp.lt.s32.totalorder (!%p189_p2), %s632_s22, 31 }
   0xb   : > { %v242_v0 = vld [vmem:[%s819_s1] sm:$0xf]  ;;  %vm312_vm0 = vcmask 1042432   ;;  %vm313_vm1 = vcmask 1043456   ;;  %v719_v1 = vmov 65535   ;;  %s825_s22 = smov (!%p216_p3, %s632_s22), 31 }
   0xc   : > { %v314_v2 = vsel %vm312_vm0, 4294967295, %v719_v1  ;;  %s633_s23 = sshll.u32 %s825_s22, 2  ;;  %vm287_vm2 = vcmask 56320   ;;  %v697_v13 = vld [vmem:[%s821_s3] sm:$0xff]  ;;  %vm404_vm3 = vcmask 130048   ;;  %vm558_vm4 = vcmask 1041409  }
   0xd   : > { %v315_v3 = vsel %vm313_vm1, %v314_v2, 0  ;;  %s219_s26 = scalar_lea.vmem %s818_s0, %s633_s23  ;;  %436 = vmatpush.bf16.msra.mxu1 %v697_v13  ;;  %699 = vmatpush.bf16.msra.mxu3 %v697_v13  ;;  %v709_v15 = vld [vmem:[%s820_s2] ss:$0 sm:$0xff]  ;;  %vm560_vm5 = vcmask 1042434   ;;  %vm562_vm6 = vcmask 1043459   ;;  %vm564_vm7 = vcmask 1044484  }
   0xe   : > { %v317_v4 = vand.u32 %v315_v3, %v242_v0  ;;  %v689_v5 = vld [vmem:[%s219_s26] sm:$0xff]  ;;  %v690_v7 = vld [vmem:[%s219_s26 + $0x8] sm:$0xff]  ;;  %v691_v9 = vld [vmem:[%s219_s26 + $0x10] sm:$0xff]  ;;  %s827_s19 = smov (!%p221_p4, %s756_s19), 1  ;;  %vm566_vm8 = vcmask 1045509   ;;  %vm568_vm9 = vcmask 1046534  }
   0xf   : > { %v693_v6 = vld [vmem:[%s219_s26 + $0x20] sm:$0xff]  ;;  %v694_v8 = vld [vmem:[%s219_s26 + $0x28] sm:$0xff]  ;;  %v695_v10 = vld [vmem:[%s219_s26 + $0x30] sm:$0xff]  ;;  %s634_s8 = sshll.u32 %s827_s19, 3  ;;  %vm570_vm10 = vcmask 1047559  }
  0x10   : > { %326 = vmatpush.bf16.msra.mxu0 %v317_v4  ;;  %698 = vmatpush.bf16.msra.mxu2 %v317_v4  ;;  %v692_v11 = vld [vmem:[%s219_s26 + $0x18] sm:$0xff]  ;;  %s224_s11 = scalar_lea.vmem %s823_s5, %s634_s8 }
  0x11   : > { %v696_v12 = vld [vmem:[%s219_s26 + $0x38] sm:$0xff] }
  0x13   : > { %667 = vmatmul.msk.bf16.vlgmr.msra.gmra.mxu0 %vm287_vm2, %v689_v5  ;;  %671 = vmatmul.msk.bf16.vlgmr.msra.gmra.mxu2 %vm287_vm2, %v693_v6 }
  0x23   : > { %668 = vmatmul.msk.bf16.gmra.mxu0 %vm287_vm2, %v690_v7  ;;  %672 = vmatmul.msk.bf16.gmra.mxu2 %vm287_vm2, %v694_v8 }
  0x33   : > { %669 = vmatmul.msk.bf16.gmra.mxu0 %vm287_vm2, %v691_v9  ;;  %673 = vmatmul.msk.bf16.gmra.mxu2 %vm287_vm2, %v695_v10 }
  0x43   : > { %670 = vmatmul.msk.bf16.gmra.mxu0 %vm287_vm2, %v692_v11  ;;  %674 = vmatmul.msk.bf16.gmra.mxu2 %vm287_vm2, %v696_v12 }
  0x90   : > { %v328_v14 = vpop.f32.mrf.mxu0 }
  0x91   : > { %v329_v16 = vadd.f32 %v709_v15, %v328_v14 }
  0x93   : > { %v368_v19 = vmax.f32 %v329_v16, 0.0 }
  0x96   : > { %v348_v17 = vpop.f32.mrf.mxu2 }
  0x97   : > { %v349_v22 = vadd.f32 %v709_v15, %v348_v17 }
  0x98   : > { %v330_v18 = vpop.f32.mrf.mxu0 }
  0x99   : > { %v331_v20 = vadd.f32 %v709_v15, %v330_v18  ;;  %v376_v27 = vmax.f32 %v349_v22, 0.0 }
  0x9b   : > { %v369_v21 = vmax.f32 %v331_v20, 0.0 }
  0x9d   : > { %v384_v23 = vpack.c.bf16 %v369_v21, %v368_v19 }
  0x9e   : > { %v350_v24 = vpop.f32.mrf.mxu2 }
  0x9f   : > { %v351_v25 = vadd.f32 %v709_v15, %v350_v24  ;;  %679 = vmatmul.msk.bf16.vlgmr.msra.gmra.mxu1 %vm404_vm3, %v384_v23 }
  0xa0   : > { %v333_v26 = vpop.f32.mrf.mxu0 }
  0xa1   : > { %v377_v28 = vmax.f32 %v351_v25, 0.0  ;;  %v334_v30 = vadd.f32 %v709_v15, %v333_v26 }
  0xa3   : > { %v388_v29 = vpack.c.bf16 %v377_v28, %v376_v27  ;;  %v370_v33 = vmax.f32 %v334_v30, 0.0 }
  0xa5   : > { %683 = vmatmul.msk.bf16.vlgmr.msra.gmra.mxu3 %vm404_vm3, %v388_v29 }
  0xa6   : > { %v353_v31 = vpop.f32.mrf.mxu2 }
  0xa7   : > { %v354_v36 = vadd.f32 %v709_v15, %v353_v31 }
  0xa8   : > { %v335_v32 = vpop.f32.mrf.mxu0 }
  0xa9   : > { %v336_v34 = vadd.f32 %v709_v15, %v335_v32  ;;  %v378_v41 = vmax.f32 %v354_v36, 0.0 }
  0xab   : > { %v371_v35 = vmax.f32 %v336_v34, 0.0 }
  0xad   : > { %v385_v37 = vpack.c.bf16 %v371_v35, %v370_v33 }
  0xae   : > { %v355_v38 = vpop.f32.mrf.mxu2 }
  0xaf   : > { %v356_v39 = vadd.f32 %v709_v15, %v355_v38  ;;  %680 = vmatmul.msk.bf16.gmra.mxu1 %vm404_vm3, %v385_v37 }
  0xb0   : > { %v338_v40 = vpop.f32.mrf.mxu0 }
  0xb1   : > { %v379_v42 = vmax.f32 %v356_v39, 0.0  ;;  %v339_v44 = vadd.f32 %v709_v15, %v338_v40 }
  0xb3   : > { %v389_v43 = vpack.c.bf16 %v379_v42, %v378_v41  ;;  %v372_v47 = vmax.f32 %v339_v44, 0.0 }
  0xb5   : > { %684 = vmatmul.msk.bf16.gmra.mxu3 %vm404_vm3, %v389_v43 }
  0xb6   : > { %v358_v45 = vpop.f32.mrf.mxu2 }
  0xb7   : > { %v359_v50 = vadd.f32 %v709_v15, %v358_v45 }
  0xb8   : > { %v340_v46 = vpop.f32.mrf.mxu0 }
  0xb9   : > { %v341_v48 = vadd.f32 %v709_v15, %v340_v46  ;;  %v380_v55 = vmax.f32 %v359_v50, 0.0 }
  0xbb   : > { %v373_v49 = vmax.f32 %v341_v48, 0.0 }
  0xbd   : > { %v386_v51 = vpack.c.bf16 %v373_v49, %v372_v47 }
  0xbe   : > { %v360_v52 = vpop.f32.mrf.mxu2 }
  0xbf   : > { %v361_v53 = vadd.f32 %v709_v15, %v360_v52  ;;  %681 = vmatmul.msk.bf16.gmra.mxu1 %vm404_vm3, %v386_v51 }
  0xc0   : > { %v343_v54 = vpop.f32.mrf.mxu0 }
  0xc1   : > { %v381_v56 = vmax.f32 %v361_v53, 0.0  ;;  %v344_v58 = vadd.f32 %v709_v15, %v343_v54 }
  0xc3   : > { %v390_v57 = vpack.c.bf16 %v381_v56, %v380_v55  ;;  %v374_v61 = vmax.f32 %v344_v58, 0.0 }
  0xc5   : > { %685 = vmatmul.msk.bf16.gmra.mxu3 %vm404_vm3, %v390_v57 }
  0xc6   : > { %v363_v59 = vpop.f32.mrf.mxu2 }
  0xc7   : > { %v364_v0 = vadd.f32 %v709_v15, %v363_v59 }
  0xc8   : > { %v345_v60 = vpop.f32.mrf.mxu0 }
  0xc9   : > { %v346_v62 = vadd.f32 %v709_v15, %v345_v60  ;;  %v382_v4 = vmax.f32 %v364_v0, 0.0 }
  0xcb   : > { %v375_v63 = vmax.f32 %v346_v62, 0.0 }
  0xcd   : > { %v387_v1 = vpack.c.bf16 %v375_v63, %v374_v61 }
  0xce   : > { %v365_v2 = vpop.f32.mrf.mxu2 }
  0xcf   : > { %v366_v3 = vadd.f32 %v709_v15, %v365_v2  ;;  %682 = vmatmul.msk.bf16.gmra.mxu1 %vm404_vm3, %v387_v1  ;;  %v792_v15 = vld [vmem:[%s822_s4] ss:$0 sm:$0xff] }
  0xd1   : > { %v383_v5 = vmax.f32 %v366_v3, 0.0 }
  0xd3   : > { %v391_v6 = vpack.c.bf16 %v383_v5, %v382_v4 }
  0xd5   : > { %686 = vmatmul.msk.bf16.gmra.mxu3 %vm404_vm3, %v391_v6 }
 0x11c   : > { %v438_v7 = vpop.f32.mrf.mxu1 }
 0x11d   : > { %v439_v22 = vadd.f32 %v792_v15, %v438_v7 }
 0x11f   : > { %v478_v29 = vmax.f32 %v439_v22, 0.0 }
 0x124   : > { %v440_v8 = vpop.f32.mrf.mxu1 }
 0x125   : > { %v441_v18 = vadd.f32 %v792_v15, %v440_v8 }
 0x127   : > { %v479_v25 = vmax.f32 %v441_v18, 0.0 }
 0x128   : > { %v458_v9 = vpop.f32.mrf.mxu3 }
 0x129   : > { %v494_v33 = vmax.f32 %v478_v29, %v479_v25  ;;  %v459_v34 = vadd.f32 %v792_v15, %v458_v9 }
 0x12b   : > { %v495_v41 = vrot.slane %v494_v33, 4  ;;  %v486_v42 = vmax.f32 %v459_v34, 0.0 }
 0x12c   : > { %v443_v10 = vpop.f32.mrf.mxu1 }
 0x12d   : > { %v444_v20 = vadd.f32 %v792_v15, %v443_v10  ;;  %v496_v52 = vmax.f32 %v494_v33, %v495_v41 }
 0x12f   : > { %v480_v28 = vmax.f32 %v444_v20, 0.0  ;;  %v497_v63 = vrot.slane %v496_v52, 2 }
 0x130   : > { %v460_v11 = vpop.f32.mrf.mxu3 }
 0x131   : > { %v461_v30 = vadd.f32 %v792_v15, %v460_v11  ;;  %v498_v8 = vmax.f32 %v496_v52, %v497_v63 }
 0x133   : > { %v487_v38 = vmax.f32 %v461_v30, 0.0  ;;  %v499_v18 = vrot.slane %v498_v8, 1 }
 0x134   : > { %v445_v12 = vpop.f32.mrf.mxu1 }
 0x135   : > { %v446_v17 = vadd.f32 %v792_v15, %v445_v12  ;;  %v522_v47 = vmax.f32 %v486_v42, %v487_v38  ;;  %v500_v30 = vmax.f32 %v498_v8, %v499_v18 }
 0x137   : > { %v481_v24 = vmax.f32 %v446_v17, 0.0  ;;  %v523_v58 = vrot.slane %v522_v47, 4 }
 0x138   : > { %v463_v13 = vpop.f32.mrf.mxu3 }
 0x139   : > { %v501_v32 = vmax.f32 %v480_v28, %v481_v24  ;;  %v464_v40 = vadd.f32 %v792_v15, %v463_v13  ;;  %v524_v5 = vmax.f32 %v522_v47, %v523_v58 }
 0x13b   : > { %v502_v39 = vrot.slane %v501_v32, 4  ;;  %v488_v50 = vmax.f32 %v464_v40, 0.0  ;;  %v525_v13 = vrot.slane %v524_v5, 2 }
 0x13c   : > { %v448_v14 = vpop.f32.mrf.mxu1 }
 0x13d   : > { %v449_v23 = vadd.f32 %v792_v15, %v448_v14  ;;  %v503_v49 = vmax.f32 %v501_v32, %v502_v39  ;;  %v526_v25 = vmax.f32 %v524_v5, %v525_v13 }
 0x13f   : > { %v482_v31 = vmax.f32 %v449_v23, 0.0  ;;  %v504_v60 = vrot.slane %v503_v49, 2 }
 0x140   : > { %v465_v16 = vpop.f32.mrf.mxu3 }
 0x141   : > { %v466_v37 = vadd.f32 %v792_v15, %v465_v16  ;;  %v505_v6 = vmax.f32 %v503_v49, %v504_v60 }
 0x143   : > { %v489_v45 = vmax.f32 %v466_v37, 0.0  ;;  %v506_v14 = vrot.slane %v505_v6, 1 }
 0x144   : > { %v450_v19 = vpop.f32.mrf.mxu1 }
 0x145   : > { %v451_v21 = vadd.f32 %v792_v15, %v450_v19  ;;  %v529_v56 = vmax.f32 %v488_v50, %v489_v45 }
 0x147   : > { %v483_v26 = vmax.f32 %v451_v21, 0.0  ;;  %v530_v3 = vrot.slane %v529_v56, 4 }
 0x148   : > { %v468_v27 = vpop.f32.mrf.mxu3 }
 0x149   : > { %v508_v35 = vmax.f32 %v482_v31, %v483_v26  ;;  %v469_v48 = vadd.f32 %v792_v15, %v468_v27  ;;  %v531_v11 = vmax.f32 %v529_v56, %v530_v3  ;;  %v507_v26 = vmax.f32 %v505_v6, %v506_v14 }
 0x14b   : > { %v509_v43 = vrot.slane %v508_v35, 4  ;;  %v490_v59 = vmax.f32 %v469_v48, 0.0  ;;  %v532_v22 = vrot.slane %v531_v11, 2  ;;  %v559_v37 = vsel %vm558_vm4, %v507_v26, %v500_v30 }
 0x14c   : > { %v453_v36 = vpop.f32.mrf.mxu1 }
 0x14d   : > { %v454_v51 = vadd.f32 %v792_v15, %v453_v36  ;;  %v510_v53 = vmax.f32 %v508_v35, %v509_v43  ;;  %v533_v33 = vmax.f32 %v531_v11, %v532_v22  ;;  %v527_v36 = vrot.slane %v526_v25, 1 }
 0x14f   : > { %v484_v61 = vmax.f32 %v454_v51, 0.0  ;;  %v511_v0 = vrot.slane %v510_v53, 2  ;;  %v534_v40 = vrot.slane %v533_v33, 1  ;;  %v528_v43 = vmax.f32 %v526_v25, %v527_v36 }
 0x150   : > { %v470_v44 = vpop.f32.mrf.mxu3 }
 0x151   : > { %v471_v46 = vadd.f32 %v792_v15, %v470_v44  ;;  %v512_v9 = vmax.f32 %v510_v53, %v511_v0  ;;  %v535_v47 = vmax.f32 %v533_v33, %v534_v40 }
 0x153   : > { %v491_v54 = vmax.f32 %v471_v46, 0.0  ;;  %v513_v19 = vrot.slane %v512_v9, 1 }
 0x154   : > { %v455_v55 = vpop.f32.mrf.mxu1 }
 0x155   : > { %v456_v57 = vadd.f32 %v792_v15, %v455_v55  ;;  %v536_v1 = vmax.f32 %v490_v59, %v491_v54  ;;  %v514_v31 = vmax.f32 %v512_v9, %v513_v19 }
 0x157   : > { %v485_v62 = vmax.f32 %v456_v57, 0.0  ;;  %v537_v10 = vrot.slane %v536_v1, 4  ;;  %v561_v38 = vsel %vm560_vm5, %v514_v31, %v559_v37 }
 0x158   : > { %v473_v2 = vpop.f32.mrf.mxu3 }
 0x159   : > { %v515_v4 = vmax.f32 %v484_v61, %v485_v62  ;;  %v474_v17 = vadd.f32 %v792_v15, %v473_v2  ;;  %v538_v20 = vmax.f32 %v536_v1, %v537_v10 }
 0x15b   : > { %v516_v7 = vrot.slane %v515_v4, 4  ;;  %v492_v28 = vmax.f32 %v474_v17, 0.0  ;;  %v539_v32 = vrot.slane %v538_v20, 2 }
 0x15d   : > { %v517_v12 = vmax.f32 %v515_v4, %v516_v7  ;;  %v540_v39 = vmax.f32 %v538_v20, %v539_v32 }
 0x15f   : > { %v518_v16 = vrot.slane %v517_v12, 2  ;;  %v541_v45 = vrot.slane %v540_v39, 1 }
 0x160   : > { %v475_v21 = vpop.f32.mrf.mxu3 }
 0x161   : > { %v519_v23 = vmax.f32 %v517_v12, %v518_v16  ;;  %v476_v24 = vadd.f32 %v792_v15, %v475_v21  ;;  %v542_v51 = vmax.f32 %v540_v39, %v541_v45 }
 0x163   : > { %v520_v27 = vrot.slane %v519_v23, 1  ;;  %v493_v29 = vmax.f32 %v476_v24, 0.0 }
 0x165   : > { %v521_v34 = vmax.f32 %v519_v23, %v520_v27  ;;  %v543_v35 = vmax.f32 %v492_v28, %v493_v29 }
 0x167   : > { %v544_v15 = vrot.slane %v543_v35, 4  ;;  %v563_v41 = vsel %vm562_vm6, %v521_v34, %v561_v38 }
 0x168   : > { %v565_v46 = vsel %vm564_vm7, %v528_v43, %v563_v41 }
 0x169   : > { %v545_v42 = vmax.f32 %v543_v35, %v544_v15  ;;  %v567_v50 = vsel %vm566_vm8, %v535_v47, %v565_v46 }
 0x16a   : > { %v569_v53 = vsel %vm568_vm9, %v542_v51, %v567_v50 }
 0x16b   : > { %v546_v44 = vrot.slane %v545_v42, 2 }
 0x16d   : > { %v547_v48 = vmax.f32 %v545_v42, %v546_v44 }
 0x16f   : > { %v548_v49 = vrot.slane %v547_v48, 1 }
 0x171   : > { %v549_v52 = vmax.f32 %v547_v48, %v548_v49 }
 0x173   : > { %v571_v54 = vsel %vm570_vm10, %v549_v52, %v569_v53 }
 0x174   : > { %573 = vst [vmem:[%s224_s11] sm:$0xff] %v571_v54 }
 0x175 PF: > { %s15_s18 = sadd.s32 1, %s717_s18  }
 0x176   : > { %p12_p5 = scmp.ge.s32.totalorder %s15_s18, 4  }
 0x178   :  { %14 = sbr.rel (!%p12_p5) target bundleno = 1 (0x1), region = 70 }

</bundles_post_ra>
